<compile_context>
chip_gen: v7x
topology: tpu7x:2x2x1
jax: 0.10.0
libtpu: 0.0.40
codegen_flags: <defaults>
</compile_context>

<pallas_src>
import jax
import jax.numpy as jnp
from jax.experimental import pallas as pl
from jax.experimental.pallas import tpu as pltpu


def _round_up(x, m):
    return (x + m - 1) // m * m


def _attention_kernel(enc_ref, dec_ref, out_ref):
    # enc_ref: (TB, S, H) input dtype; dec_ref: (TB, H); out_ref: (TB, S) f32
    enc = enc_ref[...].astype(jnp.float32)
    dec = dec_ref[...].astype(jnp.float32)

    # scores[b, s] = sum_h enc[b, s, h] * dec[b, h]
    # VPU multiply + XLU lane-reduce (kernel is DMA-bound; avoids the MXU's
    # N=1 matvec path which can force a relayout of the dominant enc block).
    scores = jnp.sum(enc * dec[:, None, :], axis=-1)          # (TB, S) f32

    # Numerically stable softmax over the source-sequence axis.
    m = jnp.max(scores, axis=-1, keepdims=True)                # (TB, 1)
    e = jnp.exp(scores - m)                                    # (TB, S)
    denom = jnp.sum(e, axis=-1, keepdims=True)                 # (TB, 1)
    out_ref[...] = (e * pl.reciprocal(denom, approx=True)).astype(out_ref.dtype)


def attention_pallas(encoder_outputs, decoder_hidden, *, block_b=None):
    """encoder_outputs [B, S, H], decoder_hidden [B, H] -> attention [B, S] (f32)."""
    B, S, H = encoder_outputs.shape
    assert decoder_hidden.shape == (B, H)
    itemsize = jnp.dtype(encoder_outputs.dtype).itemsize

    # --- batch tile: sized from *lane-padded* VMEM bytes --------------------
    # A (tb, S, H) block occupies tb * round_up(S, 8) * round_up(H, 128)
    # * itemsize bytes in VMEM (minor dim lane-pads to 128, 2nd-minor to 8).
    enc_row_vmem = _round_up(S, 8) * _round_up(H, 128) * itemsize
    target_enc_buf = 4 * 1024 * 1024       # per enc buffer; x2 double buffering
    if block_b is None:
        tb = max(1, target_enc_buf // enc_row_vmem)
    else:
        tb = max(1, int(block_b))
    tb = min(tb, B)

    if tb >= B:
        if B >= 16:
            # Keep >= 2 grid steps on the "parallel" batch axis so both v7x
            # TensorCores get work; 8-aligned for the (tb, H)/(tb, S) blocks.
            tb = max(8, (B // 2) // 8 * 8)
        else:
            tb = B                           # single full-batch block (legal)
    else:
        tb = max(8, (tb // 8) * 8)           # sublane alignment (2nd-minor dim)
        if tb >= B:
            tb = B

    grid_b = pl.cdiv(B, tb)

    # --- VMEM limit from the actual (lane-padded) footprint + headroom ------
    enc_blk = tb * _round_up(S, 8) * _round_up(H, 128) * itemsize
    dec_blk = _round_up(tb, 8) * _round_up(H, 128) * itemsize
    out_blk = _round_up(tb, 8) * _round_up(S, 128) * 4
    f32_tmp = tb * _round_up(S, 8) * _round_up(H, 128) * 4    # in-kernel temporaries
    footprint = 2 * (enc_blk + dec_blk + out_blk) + 2 * f32_tmp
    vmem_limit = int(min(100 * 1024 * 1024,                    # stay sane on 128 MiB chips
                         max(32 * 1024 * 1024,                 # raise v5e's 16 MiB default
                             footprint + 8 * 1024 * 1024)))

    cost = pl.CostEstimate(
        flops=2 * B * S * H,
        transcendentals=B * S,
        bytes_accessed=B * S * H * itemsize + B * H * itemsize + B * S * 4,
    )

    # TODO(synk): if the encoder can emit (B, H, S) (H on sublanes, S lane-dense)
    # the enc DMA becomes dense and VMEM shrinks ~4x for H<128; only worthwhile
    # if that transpose is free upstream, so we keep the module's [B, S, H] here.
    return pl.pallas_call(
        _attention_kernel,
        out_shape=jax.ShapeDtypeStruct((B, S), jnp.float32),
        grid_spec=pltpu.PrefetchScalarGridSpec(
            num_scalar_prefetch=0,
            grid=(grid_b,),
            in_specs=[
                # Full S, H dims -> no wrapper pad, no extra HBM pass over enc.
                pl.BlockSpec((tb, S, H), lambda b: (b, 0, 0)),
                pl.BlockSpec((tb, H), lambda b: (b, 0)),
            ],
            out_specs=pl.BlockSpec((tb, S), lambda b: (b, 0)),
        ),
        compiler_params=pltpu.CompilerParams(
            dimension_semantics=("parallel",),   # megacore sharding on v7x
            vmem_limit_bytes=vmem_limit,
        ),
        cost_estimate=cost,
    )(encoder_outputs, decoder_hidden)


if __name__ == "__main__":
    # Small shapes consistent with a seq2seq attention module.
    B, S, H = 2, 8, 32  # batch, source seq length, hid_dim

    key = jax.random.PRNGKey(0)
    k_enc, k_dec, k_enc2, k_dec2, k_enc3, k_dec3 = jax.random.split(key, 6)
    encoder_outputs = jax.random.normal(k_enc, (B, S, H), dtype=jnp.float32)
    decoder_hidden = jax.random.normal(k_dec, (B, H), dtype=jnp.float32)

    attn = jax.block_until_ready(attention_pallas(encoder_outputs, decoder_hidden))

    ref_scores = jnp.einsum("bsh,bh->bs", encoder_outputs, decoder_hidden)
    ref_attn = jax.nn.softmax(ref_scores, axis=-1)
    assert attn.shape == (B, S)
    assert jnp.allclose(attn, ref_attn, atol=2e-3, rtol=2e-3)
    assert jnp.allclose(jnp.sum(attn, axis=-1), 1.0, atol=2e-3)

    # Larger batch: multi-block, pipelined "parallel" grid (two batch tiles of 8).
    B2 = 16
    enc2 = jax.random.normal(k_enc2, (B2, S, H), dtype=jnp.float32)
    dec2 = jax.random.normal(k_dec2, (B2, H), dtype=jnp.float32)
    attn2 = jax.block_until_ready(attention_pallas(enc2, dec2, block_b=8))
    ref2 = jax.nn.softmax(jnp.einsum("bsh,bh->bs", enc2, dec2), axis=-1)
    assert attn2.shape == (B2, S)
    assert jnp.allclose(attn2, ref2, atol=2e-3, rtol=2e-3)

    # Ragged batch: B not a multiple of the tile -> exercises the dropped
    # out-of-bounds writes on the last grid step (no wrapper-side padding).
    B3 = 20
    enc3 = jax.random.normal(k_enc3, (B3, S, H), dtype=jnp.float32)
    dec3 = jax.random.normal(k_dec3, (B3, H), dtype=jnp.float32)
    attn3 = jax.block_until_ready(attention_pallas(enc3, dec3, block_b=8))
    ref3 = jax.nn.softmax(jnp.einsum("bsh,bh->bs", enc3, dec3), axis=-1)
    assert attn3.shape == (B3, S)
    assert jnp.allclose(attn3, ref3, atol=2e-3, rtol=2e-3)

    # TODO(synk): the original torch forward() returns None (homework stub);
    # semantics above are the standard dot-product attention it implies.
    print("KERNEL_OK")
</pallas_src>

<mosaic_0001>
module attributes {stable_mosaic.version = 11 : i64} {
  func.func @_attention_kernel(%arg0: i32, %arg1: memref<2x8x32xf32, #tpu.memory_space<vmem>>, %arg2: memref<2x32xf32, #tpu.memory_space<vmem>>, %arg3: memref<2x8xf32, #tpu.memory_space<vmem>>) attributes {dimension_semantics = [#tpu.dimension_semantics<parallel>], iteration_bounds = array<i64: 1>, scalar_prefetch = 0 : i64, scratch_operands = 0 : i64, tpu.core_type = #tpu.core_type<tc>, window_params = [{transform_indices = @transform_0, window_bounds = array<i64: 2, 8, 32>}, {transform_indices = @transform_1, window_bounds = array<i64: 2, 32>}, {transform_indices = @transform_2, window_bounds = array<i64: 2, 8>}]} {
    %c0 = arith.constant 0 : index
    %c0_0 = arith.constant 0 : index
    %c0_1 = arith.constant 0 : index
    %0 = vector.load %arg1[%c0, %c0_0, %c0_1] : memref<2x8x32xf32, #tpu.memory_space<vmem>>, vector<2x8x32xf32>
    %c0_2 = arith.constant 0 : index
    %c0_3 = arith.constant 0 : index
    %1 = vector.load %arg2[%c0_2, %c0_3] : memref<2x32xf32, #tpu.memory_space<vmem>>, vector<2x32xf32>
    %2 = vector.shape_cast %1 : vector<2x32xf32> to vector<2x1x32xf32>
    %3 = vector.broadcast %2 : vector<2x1x32xf32> to vector<2x8x32xf32>
    %4 = arith.mulf %0, %3 : vector<2x8x32xf32>
    %cst = arith.constant dense<0.000000e+00> : vector<2x8xf32>
    %5 = vector.multi_reduction <add>, %4, %cst [2] : vector<2x8x32xf32> to vector<2x8xf32>
    %cst_4 = arith.constant dense<0xFF800000> : vector<2xf32>
    %6 = vector.multi_reduction <maximumf>, %5, %cst_4 [1] : vector<2x8xf32> to vector<2xf32>
    %7 = vector.shape_cast %6 : vector<2xf32> to vector<2x1xf32>
    %8 = vector.broadcast %7 : vector<2x1xf32> to vector<2x8xf32>
    %9 = arith.subf %5, %8 : vector<2x8xf32>
    %10 = math.exp %9 : vector<2x8xf32>
    %cst_5 = arith.constant dense<0.000000e+00> : vector<2xf32>
    %11 = vector.multi_reduction <add>, %10, %cst_5 [1] : vector<2x8xf32> to vector<2xf32>
    %12 = vector.shape_cast %11 : vector<2xf32> to vector<2x1xf32>
    %13 = tpu.reciprocal %12 {approx = true} : vector<2x1xf32> -> vector<2x1xf32>
    %14 = vector.broadcast %13 : vector<2x1xf32> to vector<2x8xf32>
    %15 = arith.mulf %10, %14 : vector<2x8xf32>
    %c0_6 = arith.constant 0 : index
    %c0_7 = arith.constant 0 : index
    %16 = vector.load %arg3[%c0_6, %c0_7] : memref<2x8xf32, #tpu.memory_space<vmem>>, vector<2x8xf32>
    tpu.vector_store %arg3[%c0_6, %c0_7], %15 {strides = array<i32>} : memref<2x8xf32, #tpu.memory_space<vmem>>, vector<2x8xf32>,
    return
  }
  func.func @transform_0(%arg0: i32) -> (i32, i32, i32) {
    %c0_i32 = arith.constant 0 : i32
    %c0_i32_0 = arith.constant 0 : i32
    %c0_i32_1 = arith.constant 0 : i32
    return %arg0, %c0_i32, %c0_i32_0 : i32, i32, i32
  }
  func.func @transform_1(%arg0: i32) -> (i32, i32) {
    %c0_i32 = arith.constant 0 : i32
    %c0_i32_0 = arith.constant 0 : i32
    return %arg0, %c0_i32 : i32, i32
  }
  func.func @transform_2(%arg0: i32) -> (i32, i32) {
    %c0_i32 = arith.constant 0 : i32
    %c0_i32_0 = arith.constant 0 : i32
    return %arg0, %c0_i32 : i32, i32
  }
}

</mosaic_0001>

<bundles_post_ra>
// kernel: tpu_custom_call.1
= control target key start
LH: loop header
LB: loop body
LE: loop exit
PB: predicated region body
PF: predicated region fallthrough
CT: control target
= control target key end

     0   :  { %7 = vsyncpa [#allocation3], 0  ;;  %s301_s0 = inlined_call_operand.hbm [shape: f32[2,8,32], index: 0, kind: input, shape index: {}]   ;;  %s302_s1 = inlined_call_operand.vmem [shape: f32[2,32], index: 1, kind: input, shape index: {}]   ;;  %s303_s2 = inlined_call_operand.hbm [shape: f32[2,8], index: 2, kind: output, shape index: {}]  }
   0x1   :  { %8 = vsyncpa [#allocation4], 0  ;;  %s239_s9 = smov [#allocation2]   ;;  %s191_s13 = scalar_lea.hbm %s301_s0, 256 }
   0x2   :  { %s14_s10 = sshll.u32 %s239_s9, 4  ;;  %p192_p0 = scmp.ne.s32.totalorder %s301_s0, %s191_s13  ;;  %s15_s10 = int_to_ptr.vmem [resolvable:$true] %s14_s10 }
   0x3   :  { %p195_p1 = scmp.lt.u32.totalorder %s191_s13, %s301_s0 }
   0x5   :  { %p197_p2 = pnand %p195_p1, %p192_p0 }
   0x7   :  { %200 = shalt.err (!%p197_p2)
}
   0x8   :  { %s201_s18 = scalar_lea.vmem %s15_s10, 256  ;;  %p206_p4 = scmp.lt.s32.totalorder %s15_s10, %s15_s10 }
   0x9   :  { %p202_p3 = scmp.ne.s32.totalorder %s15_s10, %s201_s18  ;;  %p207_p5 = scmp.lt.s32.totalorder %s201_s18, %s201_s18 }
   0xb   :  { %p208_p6 = por %p207_p5, %p206_p4 }
   0xd   :  { %p209_p7 = pnand %p208_p6, %p202_p3 }
   0xf   :  { %212 = shalt.err (!%p209_p7)
}
  0x10   :  { %s240_s19 = smov 128   ;;  %s241_s20 = smov 8  }
  0x11   :  { %20 = dma.hbm_to_vmem [thread:$0]  %s301_s0, 256, %s15_s10, [#allocation3], %s240_s19, %s240_s19, %s241_s20  }
  0x12   :  { %235 = dma.done.wait [#allocation3], 256  }
  0x13   :  { %236 = vsyncadd [#allocation3], 4294967040  ;;  %v41_v0 = vlaneseq  ;;  %v242_v1 = vmov 1966171168   ;;  %v26_v12 = vld [vmem:[#allocation2] sm:$0xff]  ;;  %vm64_vm0 = vcmask 261120  }
  0x14   :  { %v39_v2 = vunpack.c.l.s4 %v242_v1  ;;  %v176_v9 = vld.sshfl [vmem:[%s302_s1] sm:$0x11 pattern:$0x75316420]  ;;  %v27_v15 = vld [vmem:[#allocation2 + $0x8] sm:$0xff]  ;;  %vm83_vm1 = vcmask 1041409  }
  0x15   :  { %v42_v3 = vshrl.u32 %v41_v0, 7  ;;  %v74_v4 = vand.u32 127, %v41_v0  ;;  %v37_v10 = vcombine.high %v176_v9, %v176_v9  ;;  %vm86_vm2 = vcmask 58368   ;;  %s244_s0 = smov [#allocation5]  }
  0x16   :  { %v40_v5 = vunpack.c.0.s8 %v39_v2  ;;  %v243_v27 = vmov 0   ;;  %s167_s1 = sshll.u32 %s244_s0, 4  ;;  %s168_s1 = int_to_ptr.vmem [resolvable:$true] %s167_s1 }
  0x17   :  { %v272_v6 = vsub.s32 %v74_v4, %v42_v3  ;;  %v54_v8 = vsub.s32 0, %v42_v3  ;;  %184 = vset.pattern.permute.xlu0 %v243_v27  ;;  %183 = vset.pattern.permute.xlu1 %v243_v27  ;;  %v97_v28 = vsub.s32 1, %v42_v3  ;;  %s213_s25 = scalar_lea.vmem %s168_s1, 32  ;;  %p218_p9 = scmp.lt.s32.totalorder %s168_s1, %s168_s1 }
  0x18   :  { %v43_v7 = vsub.s32 %v40_v5, %v42_v3  ;;  %p214_p8 = scmp.ne.s32.totalorder %s168_s1, %s213_s25  ;;  %p219_p10 = scmp.lt.s32.totalorder %s213_s25, %s213_s25 }
  0x1a   :  { %v44_v11 = vrot.slane %v176_v9, %v43_v7  ;;  %v51_v14 = vrot.slane %v37_v10, %v43_v7  ;;  %p220_p11 = por %p219_p10, %p218_p9 }
  0x1c   :  { %v55_v13 = vrot.slane %v44_v11, %v54_v8  ;;  %v59_v17 = vrot.slane %v51_v14, %v54_v8  ;;  %p221_p12 = pnand %p220_p11, %p214_p8 }
  0x1e   :  { %v62_v16 = vmul.f32 %v55_v13, %v26_v12  ;;  %v63_v19 = vmul.f32 %v59_v17, %v27_v15 }
  0x20   :  { %v65_v18 = vsel %vm64_vm0, %v62_v16, 0.0  ;;  %v68_v20 = vsel %vm64_vm0, %v63_v19, 0.0 }
  0x21   :  { %66 = vadd.xlane.f32.xlu0 %v65_v18 }
  0x25   :  { %69 = vadd.xlane.f32.xlu0 %v68_v20 }
  0xae   :  { %v67_v21 = vpop.xlane.xlu0 %66 }
  0xaf   :  { %v78_v23 = vrot.slane %v67_v21, %v272_v6 }
  0xb2   :  { %v70_v22 = vpop.xlane.xlu0 %69 }
  0xb3   :  { %v82_v24 = vrot.slane %v70_v22, %v272_v6 }
  0xb5   :  { %v84_v25 = vsel %vm83_vm1, %v82_v24, %v78_v23 }
  0xb6   :  { %v87_v26 = vsel %vm86_vm2, %v84_v25, -inf }
  0xb7   :  { %88 = vmax.xlane.f32.xlu1 %v87_v26 }
 0x144   :  { %v89_v29 = vpop.xlane.xlu1 %88 }
 0x145   :  { %v94_v30 = vrot.slane %v89_v29, %v54_v8  ;;  %v98_v31 = vrot.slane %v89_v29, %v97_v28 }
 0x147   :  { %v101_v32 = vsub.f32 %v67_v21, %v94_v30  ;;  %v102_v33 = vsub.f32 %v70_v22, %v98_v31 }
 0x149   :  { %v103_v34 = vmul.f32 1.442695, %v101_v32  ;;  %v105_v35 = vmul.f32 1.442695, %v102_v33 }
 0x14b   :  { %185 = vpow2.f32 %v103_v34 }
 0x14c   :  { %187 = vpow2.f32 %v105_v35 }
 0x155   :  { %v186_v36 = vpop.eup %185 }
 0x156   :  { %v188_v37 = vpop.eup %187  ;;  %110 = vperm.xlu1 %183, %v186_v36  }
 0x157   :  { %113 = vperm.xlu0 %184, %v188_v37  }
 0x1d5   :  { %v111_v38 = vpop.permute.xlu1 %110 }
 0x1d6   :  { %v114_v39 = vpop.permute.xlu0 %113  ;;  %v118_v40 = vrot.slane %v111_v38, %v272_v6 }
 0x1d7   :  { %v122_v41 = vrot.slane %v114_v39, %v272_v6 }
 0x1d9   :  { %v123_v42 = vsel %vm83_vm1, %v122_v41, %v118_v40 }
 0x1da   :  { %v125_v43 = vsel %vm86_vm2, %v123_v42, 0.0 }
 0x1db   :  { %126 = vadd.xlane.f32.xlu1 %v125_v43 }
 0x268   :  { %v127_v44 = vpop.xlane.xlu1 %126 }
 0x269   :  { %189 = vrcp.f32 %v127_v44 }
 0x273   :  { %v190_v45 = vpop.eup %189 }
 0x274   :  { %v133_v46 = vrot.slane %v190_v45, %v54_v8  ;;  %v137_v48 = vrot.slane %v190_v45, %v97_v28 }
 0x276   :  { %v140_v47 = vmul.f32 %v186_v36, %v133_v46  ;;  %v141_v49 = vmul.f32 %v188_v37, %v137_v48 }
 0x278   :  { %145 = vperm.xlu0 %184, %v140_v47  }
 0x27c   :  { %148 = vperm.xlu0 %184, %v141_v49  }
 0x2f7   :  { %v146_v50 = vpop.permute.xlu0 %145 }
 0x2f8   :  { %v153_v52 = vrot.slane %v146_v50, %v272_v6 }
 0x2fb   :  { %v149_v51 = vpop.permute.xlu0 %148 }
 0x2fc   :  { %v157_v53 = vrot.slane %v149_v51, %v272_v6 }
 0x2fe   :  { %v158_v54 = vsel %vm83_vm1, %v157_v53, %v153_v52 }
 0x2ff   :  { %160 = vst.msk [vmem:[#allocation5] sm:$0x3] %vm86_vm2, %v158_v54 }
 0x300   :  { %224 = shalt.err (!%p221_p12)
}
 0x301   :  { %s225_s28 = scalar_lea.hbm %s303_s2, 32 }
 0x302   :  { %p226_p13 = scmp.ne.s32.totalorder %s303_s2, %s225_s28  ;;  %p229_p0 = scmp.lt.u32.totalorder %s225_s28, %s303_s2 }
 0x304   :  { %p231_p1 = pnand %p229_p0, %p226_p13 }
 0x306   :  { %234 = shalt.err (!%p231_p1)
}
 0x307   :  { %170 = dma.vmem_to_hbm [thread:$0]  %s168_s1, 32, %s303_s2, [#allocation4]  }
 0x308   :  { %237 = dma.done.wait [#allocation4], 32  }
 0x309   :  { %238 = vsyncadd [#allocation4], 4294967264 }
 0x30a   :  { %174 = vsyncpa [#allocation3], 1 }
 0x30b   :  { %175 = vsyncpa [#allocation4], 1 }

</bundles_post_ra>
